<compile_context>
chip_gen: v7x
topology: tpu7x:2x2x1
jax: 0.10.0
libtpu: 0.0.40
codegen_flags: <defaults>
</compile_context>

<pallas_src>
import functools
import math

import jax
import jax.numpy as jnp
import numpy as np
from jax import lax
from jax.experimental import pallas as pl
from jax.experimental.pallas import tpu as pltpu


# ----------------------------------------------------------------------------
# helpers
# ----------------------------------------------------------------------------
def _xavier_uniform(key, shape):
    """Matches torch.nn.init.xavier_uniform_ fan computation."""
    if len(shape) == 2:
        fan_in, fan_out = shape[1], shape[0]
    else:
        rfs = int(np.prod(shape[2:]))
        fan_in, fan_out = shape[1] * rfs, shape[0] * rfs
    bound = math.sqrt(6.0 / (fan_in + fan_out))
    return jax.random.uniform(key, shape, jnp.float32, -bound, bound)


def _round_up(x, m):
    return ((x + m - 1) // m) * m


def _pad_rows(x, n_pad):
    if x.shape[0] == n_pad:
        return x
    pad = [(0, n_pad - x.shape[0])] + [(0, 0)] * (x.ndim - 1)
    return jnp.pad(x, pad)


def _choose_tile(n, cap, quantum, min_tile):
    """Pick (tile, padded_n) with tile a multiple of `quantum`, <= cap.

    Prefers tiles that divide the minimally-padded extent (no extra padding,
    so the post-kernel slice can be skipped); falls back to padding when the
    only exact divisors would be too small to amortize per-step overhead.
    """
    n_q = _round_up(n, quantum)
    if n_q <= cap:
        return n_q, n_q
    for t in range(cap, min_tile - 1, -quantum):
        if n_q % t == 0:
            return t, n_q
    return cap, _round_up(n_q, cap)


def _l2_normalize(x):
    # == x / max(||x||, 1e-12)  (F.normalize), via EUP rsqrt instead of sqrt+div
    ss = jnp.sum(x * x, axis=-1, keepdims=True)
    return x * lax.rsqrt(jnp.maximum(ss, 1e-24))


def _valid_row_mask(tb, valid_n):
    rows = pl.program_id(0) * tb + lax.broadcasted_iota(jnp.int32, (tb, 1), 0)
    return rows < valid_n


_LOSS_VMEM_LIMIT = 32 * 1024 * 1024   # safe on v5e/v6e/v7x
_SCORE_VMEM_LIMIT = 48 * 1024 * 1024  # <= v7x 64 MiB physical, covers 2x8 MiB blocks


# ----------------------------------------------------------------------------
# Pallas kernels
# ----------------------------------------------------------------------------
def _cf_loss_kernel(u_ref, ipos_ref, ineg_ref, ipk_ref, ink_ref, out_ref, *,
                    fusion_type, l2_lambda, valid_n, tb):
    i = pl.program_id(0)

    @pl.when(i == 0)
    def _():
        out_ref[...] = jnp.zeros_like(out_ref)

    u = u_ref[...]
    ip, ineg = ipos_ref[...], ineg_ref[...]
    ipk, ink = ipk_ref[...], ink_ref[...]

    if fusion_type == "add":
        pos_cf, neg_cf = ip + ipk, ineg + ink
        pos_s = jnp.sum(u * pos_cf, axis=1, keepdims=True)
        neg_s = jnp.sum(u * neg_cf, axis=1, keepdims=True)
        l2u = jnp.sum(u * u, axis=1, keepdims=True) / 2.0
        l2p = jnp.sum(pos_cf * pos_cf, axis=1, keepdims=True) / 2.0
        l2n = jnp.sum(neg_cf * neg_cf, axis=1, keepdims=True) / 2.0
    elif fusion_type == "mul":
        pos_cf, neg_cf = ip * ipk, ineg * ink
        pos_s = jnp.sum(u * pos_cf, axis=1, keepdims=True)
        neg_s = jnp.sum(u * neg_cf, axis=1, keepdims=True)
        l2u = jnp.sum(u * u, axis=1, keepdims=True) / 2.0
        l2p = jnp.sum(pos_cf * pos_cf, axis=1, keepdims=True) / 2.0
        l2n = jnp.sum(neg_cf * neg_cf, axis=1, keepdims=True) / 2.0
    else:  # concat: user doubled, items concatenated -> exact algebraic form
        pos_s = jnp.sum(u * ip + u * ipk, axis=1, keepdims=True)
        neg_s = jnp.sum(u * ineg + u * ink, axis=1, keepdims=True)
        l2u = jnp.sum(u * u, axis=1, keepdims=True)            # 2*sum(u^2)/2
        l2p = (jnp.sum(ip * ip, axis=1, keepdims=True)
               + jnp.sum(ipk * ipk, axis=1, keepdims=True)) / 2.0
        l2n = (jnp.sum(ineg * ineg, axis=1, keepdims=True)
               + jnp.sum(ink * ink, axis=1, keepdims=True)) / 2.0

    bpr = -jnp.log(1e-10 + jax.nn.sigmoid(pos_s - neg_s))
    contrib = bpr + l2_lambda * (l2u + l2p + l2n)
    contrib = jnp.where(_valid_row_mask(tb, valid_n), contrib, 0.0)
    out_ref[...] += jnp.sum(contrib, keepdims=True)

    @pl.when(i == pl.num_programs(0) - 1)
    def _():
        out_ref[...] /= valid_n


def _kg_transr_kernel(ent_ref, r_ref, w_ref, out_ref, *, l2_lambda, valid_n, tb):
    i = pl.program_id(0)

    @pl.when(i == 0)
    def _():
        out_ref[...] = jnp.zeros_like(out_ref)

    ent = ent_ref[...]                         # (TB, 3, D)  [h, pos_t, neg_t]
    W = w_ref[...]                             # (TB, D, R)
    r_e = r_ref[...]                           # (TB, R)

    # Per-example (3,D)@(D,R) matmuls are far too small for the MXU; a VPU
    # broadcast-multiply + reduce over D avoids TB tiny MXU push/drain pairs.
    proj = jnp.sum(ent[:, :, :, None] * W[:, None, :, :], axis=2)   # (TB, 3, R)

    r_n = _l2_normalize(r_e)
    h_n = _l2_normalize(proj[:, 0, :])
    pt_n = _l2_normalize(proj[:, 1, :])
    nt_n = _l2_normalize(proj[:, 2, :])

    pos = jnp.sqrt(jnp.sum((h_n + r_n - pt_n) ** 2, axis=-1, keepdims=True))
    neg = jnp.sqrt(jnp.sum((h_n + r_n - nt_n) ** 2, axis=-1, keepdims=True))
    hinge = jnp.maximum(pos - neg + 1.0, 0.0)

    # L2 on the normalised embeddings — matches the PyTorch reference order.
    l2 = (jnp.sum(h_n * h_n, axis=-1, keepdims=True)
          + jnp.sum(r_n * r_n, axis=-1, keepdims=True)
          + jnp.sum(pt_n * pt_n, axis=-1, keepdims=True)
          + jnp.sum(nt_n * nt_n, axis=-1, keepdims=True)) / 2.0

    contrib = hinge + l2_lambda * l2
    contrib = jnp.where(_valid_row_mask(tb, valid_n), contrib, 0.0)
    out_ref[...] += jnp.sum(contrib, keepdims=True)

    @pl.when(i == pl.num_programs(0) - 1)
    def _():
        out_ref[...] /= valid_n


def _kg_transe_kernel(h_ref, r_ref, pt_ref, nt_ref, out_ref, *,
                      l2_lambda, valid_n, tb):
    i = pl.program_id(0)

    @pl.when(i == 0)
    def _():
        out_ref[...] = jnp.zeros_like(out_ref)

    h = _l2_normalize(h_ref[...])
    r = _l2_normalize(r_ref[...])
    pt = _l2_normalize(pt_ref[...])
    nt = _l2_normalize(nt_ref[...])

    pos = jnp.sqrt(jnp.sum((h + r - pt) ** 2, axis=-1, keepdims=True))
    neg = jnp.sqrt(jnp.sum((h + r - nt) ** 2, axis=-1, keepdims=True))
    hinge = jnp.maximum(pos - neg + 1.0, 0.0)

    l2 = (jnp.sum(h * h, axis=-1, keepdims=True)
          + jnp.sum(r * r, axis=-1, keepdims=True)
          + jnp.sum(pt * pt, axis=-1, keepdims=True)
          + jnp.sum(nt * nt, axis=-1, keepdims=True)) / 2.0

    contrib = hinge + l2_lambda * l2
    contrib = jnp.where(_valid_row_mask(tb, valid_n), contrib, 0.0)
    out_ref[...] += jnp.sum(contrib, keepdims=True)

    @pl.when(i == pl.num_programs(0) - 1)
    def _():
        out_ref[...] /= valid_n


def _score_kernel(u_ref, itT_ref, out_ref):
    # u_ref: (TM, Deff) bf16; itT_ref: (Deff, TN) bf16; out_ref: (TM, TN)
    out_ref[...] = jnp.dot(u_ref[...], itT_ref[...],
                           preferred_element_type=jnp.float32
                           ).astype(out_ref.dtype)


# ----------------------------------------------------------------------------
# pallas_call wrappers
# ----------------------------------------------------------------------------
def _tiled_loss_call(kernel_fn, arrays, valid_n, tb):
    """Batch-tiled scalar-loss call with a resident (1,1) accumulator block."""
    n_pad = _round_up(valid_n, tb)
    arrays = [_pad_rows(a.astype(jnp.float32), n_pad) for a in arrays]
    grid = (n_pad // tb,)
    in_specs = []
    for a in arrays:
        nd = a.ndim
        block = (tb,) + tuple(a.shape[1:])
        in_specs.append(
            pl.BlockSpec(block, lambda i, _nd=nd: (i,) + (0,) * (_nd - 1)))
    out = pl.pallas_call(
        kernel_fn,
        grid=grid,
        in_specs=in_specs,
        out_specs=pl.BlockSpec((1, 1), lambda i: (0, 0)),
        out_shape=jax.ShapeDtypeStruct((1, 1), jnp.float32),
        compiler_params=pltpu.CompilerParams(
            dimension_semantics=("arbitrary",),
            vmem_limit_bytes=_LOSS_VMEM_LIMIT),
    )(*arrays)
    return out[0, 0]


# ----------------------------------------------------------------------------
# Module wrapper
# ----------------------------------------------------------------------------
class EmbeddingBasedPallas:
    def __init__(self, n_users, n_items, n_entities, n_relations,
                 embed_dim=32, relation_dim=32,
                 fusion_type="add", KG_embedding_type="TransR",
                 cf_l2loss_lambda=1e-5, kg_l2loss_lambda=1e-5,
                 score_dtype=jnp.float32,
                 key=jax.random.PRNGKey(42)):
        if fusion_type not in ("add", "mul", "concat"):
            raise ValueError(f"Unknown fusion type: {fusion_type}")
        self.fusion_type = fusion_type
        self.KG_embedding_type = KG_embedding_type
        self.cf_l2loss_lambda = float(cf_l2loss_lambda)
        self.kg_l2loss_lambda = float(kg_l2loss_lambda)
        # f32 preserves reference semantics; set to jnp.bfloat16 to halve the
        # dominant score-matrix HBM write if downstream ranking tolerates it.
        self.score_dtype = score_dtype

        ks = jax.random.split(key, 5)
        self.user_embed = _xavier_uniform(ks[0], (n_users, embed_dim))
        self.item_embed = _xavier_uniform(ks[1], (n_items, embed_dim))
        self.entity_embed = _xavier_uniform(ks[2], (n_entities, embed_dim))
        self.relation_embed = _xavier_uniform(ks[3], (n_relations, relation_dim))
        self.trans_M = _xavier_uniform(ks[4], (n_relations, embed_dim, relation_dim))

    # ---- CF loss --------------------------------------------------------
    def calc_cf_loss(self, user_ids, item_pos_ids, item_neg_ids):
        u = jnp.take(self.user_embed, user_ids, axis=0)
        ip = jnp.take(self.item_embed, item_pos_ids, axis=0)
        ineg = jnp.take(self.item_embed, item_neg_ids, axis=0)
        ipk = jnp.take(self.entity_embed, item_pos_ids, axis=0)
        ink = jnp.take(self.entity_embed, item_neg_ids, axis=0)
        B = int(u.shape[0])
        tb = min(1024, _round_up(B, 8))
        kernel = functools.partial(
            _cf_loss_kernel, fusion_type=self.fusion_type,
            l2_lambda=self.cf_l2loss_lambda, valid_n=B, tb=tb)
        return _tiled_loss_call(kernel, [u, ip, ineg, ipk, ink], B, tb)

    # ---- KG loss --------------------------------------------------------
    def calc_kg_loss(self, h, r, pos_t, neg_t):
        h_e = jnp.take(self.entity_embed, h, axis=0)
        r_e = jnp.take(self.relation_embed, r, axis=0)
        pt_e = jnp.take(self.entity_embed, pos_t, axis=0)
        nt_e = jnp.take(self.entity_embed, neg_t, axis=0)
        B = int(h_e.shape[0])
        if self.KG_embedding_type == "TransR":
            # TODO(synk): relation-grouped matmul (sort by r + scalar prefetch)
            # would read each W_r once instead of per-example.
            W_r = jnp.take(self.trans_M, r, axis=0)              # (B, D, R)
            ent = jnp.stack([h_e, pt_e, nt_e], axis=1)           # (B, 3, D)
            tb = min(512, _round_up(B, 8))
            kernel = functools.partial(
                _kg_transr_kernel, l2_lambda=self.kg_l2loss_lambda,
                valid_n=B, tb=tb)
            return _tiled_loss_call(kernel, [ent, r_e, W_r], B, tb)
        else:  # TransE
            tb = min(1024, _round_up(B, 8))
            kernel = functools.partial(
                _kg_transe_kernel, l2_lambda=self.kg_l2loss_lambda,
                valid_n=B, tb=tb)
            return _tiled_loss_call(kernel, [h_e, r_e, pt_e, nt_e], B, tb)

    # ---- score ----------------------------------------------------------
    def calc_score(self, user_ids, item_ids):
        u = jnp.take(self.user_embed, user_ids, axis=0)          # (Nu, D)
        it = jnp.take(self.item_embed, item_ids, axis=0)         # (Ni, D)
        kg = jnp.take(self.entity_embed, item_ids, axis=0)       # (Ni, D)

        # Fuse the item streams (and the concat K-concatenation) in the
        # wrapper so the kernel is one pure matmul with a single item operand.
        if self.fusion_type == "add":
            users, items = u, it + kg
        elif self.fusion_type == "mul":
            users, items = u, it * kg
        else:  # concat
            users = jnp.concatenate([u, u], axis=1)              # (Nu, 2D)
            items = jnp.concatenate([it, kg], axis=1)            # (Ni, 2D)

        Nu, Deff = int(users.shape[0]), int(users.shape[1])
        Ni = int(items.shape[0])

        # bf16 MXU operands (f32 accumulation) halve read-side HBM traffic.
        users_b = users.astype(jnp.bfloat16)
        itemsT = items.T.astype(jnp.bfloat16)                    # (Deff, Ni)

        # Lane-dense tiles sized for v7x's 64 MiB VMEM (bigger tiles on
        # v5e/v6e are possible but not required for correctness).
        TM, Nu_p = _choose_tile(Nu, 1024, 16, 256)
        TN, Ni_p = _choose_tile(Ni, 2048, 128, 512)

        # Keep both v7x TensorCores busy: ensure >= 2 blocks if possible.
        if (Nu_p // TM) * (Ni_p // TN) < 2:
            if TM >= 32 and (TM // 2) % 16 == 0 and Nu_p % (TM // 2) == 0:
                TM //= 2
            elif TN >= 256 and Ni_p % (TN // 2) == 0:
                TN //= 2

        users_b = _pad_rows(users_b, Nu_p)
        if Ni_p != Ni:
            itemsT = jnp.pad(itemsT, ((0, 0), (0, Ni_p - Ni)))

        grid = (Nu_p // TM, Ni_p // TN)
        out = pl.pallas_call(
            _score_kernel,
            grid=grid,
            in_specs=[
                pl.BlockSpec((TM, Deff), lambda i, j: (i, 0)),
                pl.BlockSpec((Deff, TN), lambda i, j: (0, j)),
            ],
            out_specs=pl.BlockSpec((TM, TN), lambda i, j: (i, j)),
            out_shape=jax.ShapeDtypeStruct((Nu_p, Ni_p), self.score_dtype),
            compiler_params=pltpu.CompilerParams(
                dimension_semantics=("parallel", "parallel"),
                vmem_limit_bytes=_SCORE_VMEM_LIMIT),
        )(users_b, itemsT)

        if Nu_p != Nu or Ni_p != Ni:
            out = out[:Nu, :Ni]
        return out

    # ---- forward --------------------------------------------------------
    def forward(self, *inputs, is_train, only_cf=False, only_kg=False):
        if is_train:
            user_ids, item_pos_ids, item_neg_ids, h, r, pos_t, neg_t = inputs
            if only_cf:
                return self.calc_cf_loss(user_ids, item_pos_ids, item_neg_ids)
            if only_kg:
                return self.calc_kg_loss(h, r, pos_t, neg_t)
            cf_loss = self.calc_cf_loss(user_ids, item_pos_ids, item_neg_ids)
            kg_loss = self.calc_kg_loss(h, r, pos_t, neg_t)
            return cf_loss + kg_loss
        else:
            user_ids, item_ids = inputs
            return self.calc_score(user_ids, item_ids)


# ----------------------------------------------------------------------------
# plain-JAX reference (mirrors the PyTorch source) for self-checking
# ----------------------------------------------------------------------------
def _ref_l2_mean(x):
    return jnp.mean(jnp.sum(x * x, axis=1) / 2.0)


def _ref_fuse(a, b, ftype):
    if ftype == "add":
        return a + b
    if ftype == "mul":
        return a * b
    return jnp.concatenate([a, b], axis=-1)


def _ref_cf_loss(m, user_ids, item_pos_ids, item_neg_ids):
    u = m.user_embed[user_ids]
    ip, ineg = m.item_embed[item_pos_ids], m.item_embed[item_neg_ids]
    ipk, ink = m.entity_embed[item_pos_ids], m.entity_embed[item_neg_ids]
    pos_cf = _ref_fuse(ip, ipk, m.fusion_type)
    neg_cf = _ref_fuse(ineg, ink, m.fusion_type)
    if m.fusion_type == "concat":
        u = jnp.concatenate([u, u], axis=1)
    pos_s = jnp.sum(u * pos_cf, axis=1)
    neg_s = jnp.sum(u * neg_cf, axis=1)
    cf = jnp.mean(-jnp.log(1e-10 + jax.nn.sigmoid(pos_s - neg_s)))
    l2 = _ref_l2_mean(u) + _ref_l2_mean(pos_cf) + _ref_l2_mean(neg_cf)
    return cf + m.cf_l2loss_lambda * l2


def _ref_kg_loss(m, h, r, pos_t, neg_t):
    he, re_ = m.entity_embed[h], m.relation_embed[r]
    pte, nte = m.entity_embed[pos_t], m.entity_embed[neg_t]

    def norm(x):
        n = jnp.sqrt(jnp.sum(x * x, axis=-1, keepdims=True))
        return x / jnp.maximum(n, 1e-12)

    if m.KG_embedding_type == "TransR":
        W = m.trans_M[r]
        he = jnp.einsum("bd,bdr->br", he, W, precision=lax.Precision.HIGHEST)
        pte = jnp.einsum("bd,bdr->br", pte, W, precision=lax.Precision.HIGHEST)
        nte = jnp.einsum("bd,bdr->br", nte, W, precision=lax.Precision.HIGHEST)
    r_n, h_n, pt_n, nt_n = norm(re_), norm(he), norm(pte), norm(nte)
    pos = jnp.sqrt(jnp.sum((h_n + r_n - pt_n) ** 2, axis=-1))
    neg = jnp.sqrt(jnp.sum((h_n + r_n - nt_n) ** 2, axis=-1))
    kg = jnp.mean(jnp.maximum(pos - neg + 1.0, 0.0))
    l2 = (_ref_l2_mean(h_n) + _ref_l2_mean(r_n)
          + _ref_l2_mean(pt_n) + _ref_l2_mean(nt_n))
    return kg + m.kg_l2loss_lambda * l2


def _ref_score(m, user_ids, item_ids):
    u = m.user_embed[user_ids]
    cf = _ref_fuse(m.item_embed[item_ids], m.entity_embed[item_ids],
                   m.fusion_type)
    if m.fusion_type == "concat":
        u = jnp.concatenate([u, u], axis=1)
    return jnp.matmul(u, cf.T, precision=lax.Precision.HIGHEST)


# ----------------------------------------------------------------------------
# main
# ----------------------------------------------------------------------------
if __name__ == "__main__":
    n_users, n_items, n_entities, n_relations = 16, 16, 24, 4
    embed_dim = relation_dim = 32
    cf_batch, kg_batch = 8, 8

    key = jax.random.PRNGKey(0)
    k = jax.random.split(key, 7)
    user_ids = jax.random.randint(k[0], (cf_batch,), 0, n_users)
    item_pos_ids = jax.random.randint(k[1], (cf_batch,), 0, n_items)
    item_neg_ids = jax.random.randint(k[2], (cf_batch,), 0, n_items)
    h = jax.random.randint(k[3], (kg_batch,), 0, n_entities)
    r = jax.random.randint(k[4], (kg_batch,), 0, n_relations)
    pos_t = jax.random.randint(k[5], (kg_batch,), 0, n_entities)
    neg_t = jax.random.randint(k[6], (kg_batch,), 0, n_entities)

    configs = [("add", "TransR"), ("mul", "TransE"), ("concat", "TransE")]
    for fusion_type, kg_type in configs:
        model = EmbeddingBasedPallas(
            n_users, n_items, n_entities, n_relations,
            embed_dim=embed_dim, relation_dim=relation_dim,
            fusion_type=fusion_type, KG_embedding_type=kg_type,
            cf_l2loss_lambda=1e-5, kg_l2loss_lambda=1e-5,
            key=jax.random.PRNGKey(42))

        # training path: total loss (cf + kg)
        loss = model.forward(user_ids, item_pos_ids, item_neg_ids,
                             h, r, pos_t, neg_t, is_train=True)
        loss = jax.block_until_ready(loss)
        ref_loss = (_ref_cf_loss(model, user_ids, item_pos_ids, item_neg_ids)
                    + _ref_kg_loss(model, h, r, pos_t, neg_t))
        assert jnp.isfinite(loss), f"loss not finite ({fusion_type}/{kg_type})"
        np.testing.assert_allclose(np.asarray(loss), np.asarray(ref_loss),
                                   rtol=5e-2, atol=5e-2)

        # eval path: user x item score matrix
        score = model.forward(jnp.arange(n_users), jnp.arange(n_items),
                              is_train=False)
        score = jax.block_until_ready(score)
        ref_score = _ref_score(model, jnp.arange(n_users), jnp.arange(n_items))
        assert score.shape == (n_users, n_items)
        np.testing.assert_allclose(np.asarray(score), np.asarray(ref_score),
                                   rtol=5e-2, atol=5e-2)

    print("KERNEL_OK")
</pallas_src>

<mosaic_0001>
module attributes {stable_mosaic.version = 11 : i64} {
  func.func @_cf_loss_kernel(%arg0: i32, %arg1: memref<8x32xf32, #tpu.memory_space<vmem>>, %arg2: memref<8x32xf32, #tpu.memory_space<vmem>>, %arg3: memref<8x32xf32, #tpu.memory_space<vmem>>, %arg4: memref<8x32xf32, #tpu.memory_space<vmem>>, %arg5: memref<8x32xf32, #tpu.memory_space<vmem>>, %arg6: memref<1x1xf32, #tpu.memory_space<vmem>>) attributes {dimension_semantics = [#tpu.dimension_semantics<arbitrary>], iteration_bounds = array<i64: 1>, scalar_prefetch = 0 : i64, scratch_operands = 0 : i64, tpu.core_type = #tpu.core_type<tc>, window_params = [{transform_indices = @transform_0, window_bounds = array<i64: 8, 32>}, {transform_indices = @transform_1, window_bounds = array<i64: 8, 32>}, {transform_indices = @transform_2, window_bounds = array<i64: 8, 32>}, {transform_indices = @transform_3, window_bounds = array<i64: 8, 32>}, {transform_indices = @transform_4, window_bounds = array<i64: 8, 32>}, {pipeline_mode = #tpu.pipeline_mode<synchronous>, transform_indices = @transform_5, window_bounds = array<i64: 1, 1>}]} {
    %c0_i32 = arith.constant 0 : i32
    %0 = arith.cmpi eq, %arg0, %c0_i32 : i32
    %1 = arith.extui %0 : i1 to i32
    %c0_i32_0 = arith.constant 0 : i32
    %2 = arith.cmpi ne, %1, %c0_i32_0 : i32
    scf.if %2 {
      %cst_30 = arith.constant 0.000000e+00 : f32
      %66 = vector.broadcast %cst_30 : f32 to vector<1x1xf32>
      %c0_31 = arith.constant 0 : index
      %c0_32 = arith.constant 0 : index
      %67 = vector.load %arg6[%c0_31, %c0_32] : memref<1x1xf32, #tpu.memory_space<vmem>>, vector<1x1xf32>
      tpu.vector_store %arg6[%c0_31, %c0_32], %66 {strides = array<i32>} : memref<1x1xf32, #tpu.memory_space<vmem>>, vector<1x1xf32>,
    } else {
    }
    %c0 = arith.constant 0 : index
    %c0_1 = arith.constant 0 : index
    %3 = vector.load %arg1[%c0, %c0_1] : memref<8x32xf32, #tpu.memory_space<vmem>>, vector<8x32xf32>
    %c0_2 = arith.constant 0 : index
    %c0_3 = arith.constant 0 : index
    %4 = vector.load %arg2[%c0_2, %c0_3] : memref<8x32xf32, #tpu.memory_space<vmem>>, vector<8x32xf32>
    %c0_4 = arith.constant 0 : index
    %c0_5 = arith.constant 0 : index
    %5 = vector.load %arg3[%c0_4, %c0_5] : memref<8x32xf32, #tpu.memory_space<vmem>>, vector<8x32xf32>
    %c0_6 = arith.constant 0 : index
    %c0_7 = arith.constant 0 : index
    %6 = vector.load %arg4[%c0_6, %c0_7] : memref<8x32xf32, #tpu.memory_space<vmem>>, vector<8x32xf32>
    %c0_8 = arith.constant 0 : index
    %c0_9 = arith.constant 0 : index
    %7 = vector.load %arg5[%c0_8, %c0_9] : memref<8x32xf32, #tpu.memory_space<vmem>>, vector<8x32xf32>
    %8 = arith.addf %4, %6 : vector<8x32xf32>
    %9 = arith.addf %5, %7 : vector<8x32xf32>
    %10 = arith.mulf %3, %8 : vector<8x32xf32>
    %cst = arith.constant dense<0.000000e+00> : vector<8xf32>
    %11 = vector.multi_reduction <add>, %10, %cst [1] : vector<8x32xf32> to vector<8xf32>
    %12 = vector.shape_cast %11 : vector<8xf32> to vector<8x1xf32>
    %13 = arith.mulf %3, %9 : vector<8x32xf32>
    %cst_10 = arith.constant dense<0.000000e+00> : vector<8xf32>
    %14 = vector.multi_reduction <add>, %13, %cst_10 [1] : vector<8x32xf32> to vector<8xf32>
    %15 = vector.shape_cast %14 : vector<8xf32> to vector<8x1xf32>
    %16 = arith.mulf %3, %3 : vector<8x32xf32>
    %cst_11 = arith.constant dense<0.000000e+00> : vector<8xf32>
    %17 = vector.multi_reduction <add>, %16, %cst_11 [1] : vector<8x32xf32> to vector<8xf32>
    %18 = vector.shape_cast %17 : vector<8xf32> to vector<8x1xf32>
    %cst_12 = arith.constant 2.000000e+00 : f32
    %19 = vector.broadcast %cst_12 : f32 to vector<8x1xf32>
    %20 = arith.divf %18, %19 : vector<8x1xf32>
    %21 = arith.mulf %8, %8 : vector<8x32xf32>
    %cst_13 = arith.constant dense<0.000000e+00> : vector<8xf32>
    %22 = vector.multi_reduction <add>, %21, %cst_13 [1] : vector<8x32xf32> to vector<8xf32>
    %23 = vector.shape_cast %22 : vector<8xf32> to vector<8x1xf32>
    %cst_14 = arith.constant 2.000000e+00 : f32
    %24 = vector.broadcast %cst_14 : f32 to vector<8x1xf32>
    %25 = arith.divf %23, %24 : vector<8x1xf32>
    %26 = arith.mulf %9, %9 : vector<8x32xf32>
    %cst_15 = arith.constant dense<0.000000e+00> : vector<8xf32>
    %27 = vector.multi_reduction <add>, %26, %cst_15 [1] : vector<8x32xf32> to vector<8xf32>
    %28 = vector.shape_cast %27 : vector<8xf32> to vector<8x1xf32>
    %cst_16 = arith.constant 2.000000e+00 : f32
    %29 = vector.broadcast %cst_16 : f32 to vector<8x1xf32>
    %30 = arith.divf %28, %29 : vector<8x1xf32>
    %31 = arith.subf %12, %15 : vector<8x1xf32>
    %32 = arith.negf %31 : vector<8x1xf32>
    %33 = math.exp %32 : vector<8x1xf32>
    %cst_17 = arith.constant 1.000000e+00 : f32
    %34 = vector.broadcast %cst_17 : f32 to vector<8x1xf32>
    %35 = arith.addf %34, %33 : vector<8x1xf32>
    %36 = arith.divf %34, %35 : vector<8x1xf32>
    %cst_18 = arith.constant 1.000000e-10 : f32
    %37 = vector.broadcast %cst_18 : f32 to vector<8x1xf32>
    %38 = arith.addf %37, %36 : vector<8x1xf32>
    %39 = math.log %38 : vector<8x1xf32>
    %cst_19 = arith.constant 0.000000e+00 : f32
    %40 = vector.broadcast %cst_19 : f32 to vector<8x1xf32>
    %41 = arith.subf %40, %39 : vector<8x1xf32>
    %42 = arith.addf %20, %25 : vector<8x1xf32>
    %43 = arith.addf %42, %30 : vector<8x1xf32>
    %cst_20 = arith.constant 9.99999974E-6 : f32
    %44 = vector.broadcast %cst_20 : f32 to vector<8x1xf32>
    %45 = arith.mulf %44, %43 : vector<8x1xf32>
    %46 = arith.addf %41, %45 : vector<8x1xf32>
    %c8_i32 = arith.constant 8 : i32
    %47 = arith.muli %arg0, %c8_i32 : i32
    %48 = tpu.iota {dimensions = array<i32: 0>} : vector<8x1xi32>
    %49 = vector.broadcast %47 : i32 to vector<8x1xi32>
    %50 = arith.addi %49, %48 : vector<8x1xi32>
    %c8_i32_21 = arith.constant 8 : i32
    %51 = vector.broadcast %c8_i32_21 : i32 to vector<8x1xi32>
    %52 = arith.cmpi slt, %50, %51 : vector<8x1xi32>
    %cst_22 = arith.constant 0.000000e+00 : f32
    %53 = vector.broadcast %cst_22 : f32 to vector<8x1xf32>
    %54 = arith.select %52, %46, %53 : vector<8x1xi1>, vector<8x1xf32>
    %c0_23 = arith.constant 0 : index
    %c0_24 = arith.constant 0 : index
    %55 = vector.load %arg6[%c0_23, %c0_24] : memref<1x1xf32, #tpu.memory_space<vmem>>, vector<1x1xf32>
    %56 = vector.shape_cast %54 : vector<8x1xf32> to vector<1x8x1xf32>
    %cst_25 = arith.constant dense<0.000000e+00> : vector<1xf32>
    %57 = vector.multi_reduction <add>, %56, %cst_25 [1, 2] : vector<1x8x1xf32> to vector<1xf32>
    %58 = vector.shape_cast %57 : vector<1xf32> to vector<1x1x1xf32>
    %59 = vector.extract %58[0, 0, 0] : f32 from vector<1x1x1xf32>
    %60 = vector.broadcast %59 : f32 to vector<1x1xf32>
    %61 = arith.addf %55, %60 : vector<1x1xf32>
    %c0_26 = arith.constant 0 : index
    %c0_27 = arith.constant 0 : index
    %62 = vector.load %arg6[%c0_26, %c0_27] : memref<1x1xf32, #tpu.memory_space<vmem>>, vector<1x1xf32>
    tpu.vector_store %arg6[%c0_26, %c0_27], %61 {strides = array<i32>} : memref<1x1xf32, #tpu.memory_space<vmem>>, vector<1x1xf32>,
    %c0_i32_28 = arith.constant 0 : i32
    %63 = arith.cmpi eq, %arg0, %c0_i32_28 : i32
    %64 = arith.extui %63 : i1 to i32
    %c0_i32_29 = arith.constant 0 : i32
    %65 = arith.cmpi ne, %64, %c0_i32_29 : i32
    scf.if %65 {
      %c0_30 = arith.constant 0 : index
      %c0_31 = arith.constant 0 : index
      %66 = vector.load %arg6[%c0_30, %c0_31] : memref<1x1xf32, #tpu.memory_space<vmem>>, vector<1x1xf32>
      %cst_32 = arith.constant 8.000000e+00 : f32
      %67 = vector.broadcast %cst_32 : f32 to vector<1x1xf32>
      %68 = arith.divf %66, %67 : vector<1x1xf32>
      %c0_33 = arith.constant 0 : index
      %c0_34 = arith.constant 0 : index
      %69 = vector.load %arg6[%c0_33, %c0_34] : memref<1x1xf32, #tpu.memory_space<vmem>>, vector<1x1xf32>
      tpu.vector_store %arg6[%c0_33, %c0_34], %68 {strides = array<i32>} : memref<1x1xf32, #tpu.memory_space<vmem>>, vector<1x1xf32>,
    } else {
    }
    return
  }
  func.func @transform_0(%arg0: i32) -> (i32, i32) {
    %c0_i32 = arith.constant 0 : i32
    %c0_i32_0 = arith.constant 0 : i32
    return %arg0, %c0_i32 : i32, i32
  }
  func.func @transform_1(%arg0: i32) -> (i32, i32) {
    %c0_i32 = arith.constant 0 : i32
    %c0_i32_0 = arith.constant 0 : i32
    return %arg0, %c0_i32 : i32, i32
  }
  func.func @transform_2(%arg0: i32) -> (i32, i32) {
    %c0_i32 = arith.constant 0 : i32
    %c0_i32_0 = arith.constant 0 : i32
    return %arg0, %c0_i32 : i32, i32
  }
  func.func @transform_3(%arg0: i32) -> (i32, i32) {
    %c0_i32 = arith.constant 0 : i32
    %c0_i32_0 = arith.constant 0 : i32
    return %arg0, %c0_i32 : i32, i32
  }
  func.func @transform_4(%arg0: i32) -> (i32, i32) {
    %c0_i32 = arith.constant 0 : i32
    %c0_i32_0 = arith.constant 0 : i32
    return %arg0, %c0_i32 : i32, i32
  }
  func.func @transform_5(%arg0: i32) -> (i32, i32) {
    %c0_i32 = arith.constant 0 : i32
    %c0_i32_0 = arith.constant 0 : i32
    %c0_i32_1 = arith.constant 0 : i32
    return %c0_i32, %c0_i32_0 : i32, i32
  }
}

</mosaic_0001>

<bundles_post_ra>
// kernel: tpu_custom_call.1
= control target key start
LH: loop header
LB: loop body
LE: loop exit
PB: predicated region body
PF: predicated region fallthrough
CT: control target
= control target key end

     0   :  { %10 = vsyncpa [#allocation3], 0  ;;  %s403_s0 = inlined_call_operand.hbm [shape: f32[8,32], index: 0, kind: input, shape index: {}]   ;;  %s404_s1 = inlined_call_operand.hbm [shape: f32[8,32], index: 1, kind: input, shape index: {}]   ;;  %s405_s2 = inlined_call_operand.hbm [shape: f32[8,32], index: 2, kind: input, shape index: {}]   ;;  %s406_s3 = inlined_call_operand.vmem [shape: f32[8,32], index: 3, kind: input, shape index: {}]   ;;  %s407_s4 = inlined_call_operand.hbm [shape: f32[8,32], index: 4, kind: input, shape index: {}]   ;;  %s408_s5 = inlined_call_operand.hbm [shape: f32[1,1], index: 5, kind: output, shape index: {}]  }
   0x1   :  { %11 = vsyncpa [#allocation6], 0 }
   0x2   :  { %12 = vsyncpa [#allocation9], 0 }
   0x3   :  { %13 = vsyncpa [#allocation4], 0  ;;  %s301_s18 = smov [#allocation5]   ;;  %s302_s20 = smov [#allocation2]  }
   0x4   :  { %s30_s19 = sshll.u32 %s301_s18, 4  ;;  %s20_s21 = sshll.u32 %s302_s20, 4  ;;  %s31_s19 = int_to_ptr.vmem [resolvable:$true] %s30_s19  ;;  %s21_s21 = int_to_ptr.vmem [resolvable:$true] %s20_s21 }
   0x5   :  { %s183_s24 = scalar_lea.hbm %s404_s1, 128 }
   0x6   :  { %p184_p0 = scmp.ne.s32.totalorder %s404_s1, %s183_s24  ;;  %p187_p1 = scmp.lt.u32.totalorder %s183_s24, %s404_s1 }
   0x8   :  { %p189_p2 = pnand %p187_p1, %p184_p0 }
   0xa   :  { %192 = shalt.err (!%p189_p2)
}
   0xb   :  { %s193_s29 = scalar_lea.vmem %s31_s19, 128  ;;  %p198_p4 = scmp.lt.s32.totalorder %s31_s19, %s31_s19 }
   0xc   :  { %p194_p3 = scmp.ne.s32.totalorder %s31_s19, %s193_s29  ;;  %p199_p5 = scmp.lt.s32.totalorder %s193_s29, %s193_s29 }
   0xe   :  { %p200_p6 = por %p199_p5, %p198_p4 }
  0x10   :  { %p201_p7 = pnand %p200_p6, %p194_p3 }
  0x12   :  { %204 = shalt.err (!%p201_p7)
}
  0x13   :  { %33 = dma.hbm_to_vmem [thread:$0]  %s404_s1, 128, %s31_s19, [#allocation6]  }
  0x14   :  { %s205_s9 = scalar_lea.hbm %s403_s0, 128 }
  0x15   :  { %p206_p8 = scmp.ne.s32.totalorder %s403_s0, %s205_s9  ;;  %p209_p9 = scmp.lt.u32.totalorder %s205_s9, %s403_s0 }
  0x17   :  { %p211_p10 = pnand %p209_p9, %p206_p8 }
  0x19   :  { %214 = shalt.err (!%p211_p10)
}
  0x1a   :  { %s215_s14 = scalar_lea.vmem %s21_s21, 128  ;;  %p220_p12 = scmp.lt.s32.totalorder %s21_s21, %s21_s21 }
  0x1b   :  { %p216_p11 = scmp.ne.s32.totalorder %s21_s21, %s215_s14  ;;  %p221_p13 = scmp.lt.s32.totalorder %s215_s14, %s215_s14 }
  0x1d   :  { %p222_p0 = por %p221_p13, %p220_p12 }
  0x1f   :  { %p223_p1 = pnand %p222_p0, %p216_p11 }
  0x21   :  { %226 = shalt.err (!%p223_p1)
}
  0x22   :  { %23 = dma.hbm_to_vmem [thread:$0]  %s403_s0, 128, %s21_s21, [#allocation3]  }
  0x23   :  { %s303_s16 = smov [#allocation7]   ;;  %s304_s18 = smov [#allocation8]  }
  0x24   :  { %s40_s17 = sshll.u32 %s303_s16, 4  ;;  %s52_s19 = sshll.u32 %s304_s18, 4  ;;  %s41_s17 = int_to_ptr.vmem [resolvable:$true] %s40_s17  ;;  %s53_s19 = int_to_ptr.vmem [resolvable:$true] %s52_s19 }
  0x25   :  { %s227_s23 = scalar_lea.hbm %s405_s2, 128 }
  0x26   :  { %p228_p2 = scmp.ne.s32.totalorder %s405_s2, %s227_s23  ;;  %p231_p3 = scmp.lt.u32.totalorder %s227_s23, %s405_s2 }
  0x28   :  { %p233_p4 = pnand %p231_p3, %p228_p2 }
  0x2a   :  { %236 = shalt.err (!%p233_p4)
}
  0x2b   :  { %s237_s0 = scalar_lea.vmem %s41_s17, 128  ;;  %p242_p6 = scmp.lt.s32.totalorder %s41_s17, %s41_s17 }
  0x2c   :  { %p238_p5 = scmp.ne.s32.totalorder %s41_s17, %s237_s0  ;;  %p243_p7 = scmp.lt.s32.totalorder %s237_s0, %s237_s0 }
  0x2e   :  { %p244_p8 = por %p243_p7, %p242_p6 }
  0x30   :  { %p245_p9 = pnand %p244_p8, %p238_p5 }
  0x32   :  { %248 = shalt.err (!%p245_p9)
}
  0x33   :  { %43 = dma.hbm_to_vmem [thread:$0]  %s405_s2, 128, %s41_s17, [#allocation6]  }
  0x34   :  { %s249_s6 = scalar_lea.hbm %s407_s4, 128 }
  0x35   :  { %p250_p10 = scmp.ne.s32.totalorder %s407_s4, %s249_s6  ;;  %p253_p11 = scmp.lt.u32.totalorder %s249_s6, %s407_s4 }
  0x37   :  { %p255_p12 = pnand %p253_p11, %p250_p10 }
  0x39   :  { %258 = shalt.err (!%p255_p12)
}
  0x3a   :  { %s259_s11 = scalar_lea.vmem %s53_s19, 128  ;;  %p264_p0 = scmp.lt.s32.totalorder %s53_s19, %s53_s19 }
  0x3b   :  { %p260_p13 = scmp.ne.s32.totalorder %s53_s19, %s259_s11  ;;  %p265_p1 = scmp.lt.s32.totalorder %s259_s11, %s259_s11 }
  0x3d   :  { %p266_p2 = por %p265_p1, %p264_p0 }
  0x3f   :  { %p267_p3 = pnand %p266_p2, %p260_p13 }
  0x41   :  { %270 = shalt.err (!%p267_p3)
}
  0x42   :  { %55 = dma.hbm_to_vmem [thread:$0]  %s407_s4, 128, %s53_s19, [#allocation9]  }
  0x43   :  { %293 = dma.done.wait [#allocation3], 128  }
  0x44   :  { %294 = vsyncadd [#allocation3], 4294967168 }
  0x45   :  { %295 = dma.done.wait [#allocation6], 256  }
  0x46   :  { %296 = vsyncadd [#allocation6], 4294967040 }
  0x47   :  { %297 = dma.done.wait [#allocation9], 128  }
  0x48   :  { %298 = vsyncadd [#allocation9], 4294967168  ;;  %v74_v0 = vld [vmem:[#allocation2] sm:$0xff]  ;;  %v75_v1 = vld [vmem:[#allocation5] sm:$0xff]  ;;  %vm82_vm0 = vcmask 261120   ;;  %vm129_vm1 = vcmask 7168  }
  0x49   :  { %v77_v2 = vld [vmem:[%s406_s3] sm:$0xff]  ;;  %v76_v4 = vld [vmem:[#allocation7] sm:$0xff]  ;;  %v78_v5 = vld [vmem:[#allocation8] sm:$0xff]  ;;  %v90_v6 = vmul.f32 %v74_v0, %v74_v0  ;;  %vm72_vm2 = vcmask 0   ;;  %v305_v39 = vmov 0.0   ;;  %s306_s4 = smov [#allocation10]  }
  0x4a   :  { %v79_v3 = vadd.f32 %v77_v2, %v75_v1  ;;  %v80_v7 = vadd.f32 %v78_v5, %v76_v4  ;;  %73 = vst.msk [vmem:[#allocation10] sm:$0x1] %vm72_vm2, %v305_v39  ;;  %s157_s1 = sshll.u32 %s306_s4, 4  ;;  %s158_s1 = int_to_ptr.vmem [resolvable:$true] %s157_s1 }
  0x4b   :  { %v91_v9 = vsel %vm82_vm0, %v90_v6, 0.0  ;;  %s271_s15 = scalar_lea.vmem %s158_s1, 16  ;;  %s275_s16 = scalar_lea.vmem %s158_s1, 32 }
  0x4c   :  { %v81_v8 = vmul.f32 %v79_v3, %v74_v0  ;;  %v96_v10 = vmul.f32 %v79_v3, %v79_v3  ;;  %v86_v11 = vmul.f32 %v80_v7, %v74_v0  ;;  %92 = vadd.xlane.f32.xlu1 %v91_v9  ;;  %v101_v15 = vmul.f32 %v80_v7, %v80_v7  ;;  %p272_p4 = scmp.ne.s32.totalorder %s158_s1, %s271_s15  ;;  %p276_p5 = scmp.lt.s32.totalorder %s158_s1, %s158_s1 }
  0x4d   :  { %p277_p6 = scmp.lt.s32.totalorder %s275_s16, %s271_s15 }
  0x4e   :  { %v83_v12 = vsel %vm82_vm0, %v81_v8, 0.0  ;;  %v97_v13 = vsel %vm82_vm0, %v96_v10, 0.0  ;;  %v87_v14 = vsel %vm82_vm0, %v86_v11, 0.0  ;;  %v102_v16 = vsel %vm82_vm0, %v101_v15, 0.0 }
  0x4f   :  { %84 = vadd.xlane.f32.xlu0 %v83_v12  ;;  %p278_p7 = por %p277_p6, %p276_p5 }
  0x50   :  { %98 = vadd.xlane.f32.xlu1 %v97_v13 }
  0x51   :  { %v128_v47 = vld [vmem:[#allocation10] sm:$0x1]  ;;  %p279_p8 = pnand %p278_p7, %p272_p4 }
  0x53   :  { %88 = vadd.xlane.f32.xlu0 %v87_v14 }
  0x57   :  { %103 = vadd.xlane.f32.xlu0 %v102_v16 }
  0xd9   :  { %v93_v23 = vpop.xlane.xlu1 %92 }
  0xda   :  { %v95_v27 = vmul.f32 0.5, %v93_v23 }
  0xdc   :  { %v85_v17 = vpop.xlane.xlu0 %84 }
  0xdd   :  { %v99_v26 = vpop.xlane.xlu1 %98 }
  0xde   :  { %v100_v28 = vmul.f32 0.5, %v99_v26 }
  0xe0   :  { %v89_v18 = vpop.xlane.xlu0 %88  ;;  %v117_v30 = vadd.f32 %v100_v28, %v95_v27 }
  0xe1   :  { %v106_v19 = vsub.f32 %v85_v17, %v89_v18 }
  0xe3   :  { %v168_v20 = vmul.f32 -1.442695, %v106_v19 }
  0xe4   :  { %v104_v29 = vpop.xlane.xlu0 %103 }
  0xe5   :  { %177 = vpow2.f32 %v168_v20  ;;  %v105_v31 = vmul.f32 0.5, %v104_v29 }
  0xe7   :  { %v118_v32 = vadd.f32 %v117_v30, %v105_v31 }
  0xe9   :  { %v119_v35 = vmul.f32 1e-05, %v118_v32 }
  0xef   :  { %v178_v21 = vpop.eup %177 }
  0xf0   :  { %v110_v22 = vadd.f32 1.0, %v178_v21 }
  0xf2   :  { %179 = vrcp.f32 %v110_v22 }
  0xfc   :  { %v180_v24 = vpop.eup %179 }
  0xfd   :  { %v113_v25 = vadd.f32 1e-10, %v180_v24 }
  0xff   :  { %181 = vlog2.f32 %v113_v25 }
 0x109   :  { %v182_v33 = vpop.eup %181 }
 0x10a   :  { %v115_v34 = vmul.f32 0.6931472, %v182_v33 }
 0x10c   :  { %v116_v36 = vsub.f32 0.0, %v115_v34 }
 0x10e   :  { %v120_v37 = vadd.f32 %v119_v35, %v116_v36 }
 0x110   :  { %v130_v38 = vsel %vm129_vm1, %v120_v37, 0.0 }
 0x111   :  { %131 = vadd.xlane.f32.xlu1 %v130_v38 }
 0x19e   :  { %v132_v40 = vpop.xlane.xlu1 %131 }
 0x19f   :  { %v133_v41 = vrot.slane %v132_v40, 4 }
 0x1a1   :  { %v134_v42 = vadd.f32 %v133_v41, %v132_v40 }
 0x1a3   :  { %v135_v43 = vrot.slane %v134_v42, 2 }
 0x1a5   :  { %v136_v44 = vadd.f32 %v135_v43, %v134_v42 }
 0x1a7   :  { %v137_v45 = vrot.slane %v136_v44, 1 }
 0x1a9   :  { %v138_v46 = vadd.f32 %v137_v45, %v136_v44 }
 0x1ab   :  { %169 = vpush %v138_v46 }
 0x1dc   :  { %s170_s3 = spop %169 }
 0x1dd   :  { %v140_v48 = vstv %s170_s3 }
 0x1de   :  { %v141_v49 = vadd.f32 %v140_v48, %v128_v47 }
 0x1e0   :  { %143 = vst.msk [vmem:[#allocation10] sm:$0x1] %vm72_vm2, %v141_v49 }
 0x1e7   :  { %v147_v50 = vld [vmem:[#allocation10] sm:$0x1] }
 0x1e8   :  { %v149_v51 = vmul.f32 0.125, %v147_v50 }
 0x1ea   :  { %150 = vst.msk [vmem:[#allocation10] sm:$0x1] %vm72_vm2, %v149_v51 }
 0x1eb   :  { %282 = shalt.err (!%p279_p8)
}
 0x1ec   :  { %s283_s19 = scalar_lea.hbm %s408_s5, 16 }
 0x1ed   :  { %p284_p9 = scmp.ne.s32.totalorder %s408_s5, %s283_s19  ;;  %p287_p10 = scmp.lt.u32.totalorder %s283_s19, %s408_s5 }
 0x1ef   :  { %p289_p11 = pnand %p287_p10, %p284_p9 }
 0x1f1   :  { %292 = shalt.err (!%p289_p11)
}
 0x1f2   :  { %160 = dma.vmem_to_hbm [thread:$0]  %s158_s1, 16, %s408_s5, [#allocation4]  }
 0x1f3   :  { %299 = dma.done.wait [#allocation4], 16  }
 0x1f4   :  { %300 = vsyncadd [#allocation4], 4294967280 }
 0x1f5   :  { %164 = vsyncpa [#allocation3], 1 }
 0x1f6   :  { %165 = vsyncpa [#allocation6], 1 }
 0x1f7   :  { %166 = vsyncpa [#allocation9], 1 }
 0x1f8   :  { %167 = vsyncpa [#allocation4], 1 }

</bundles_post_ra>
